<compile_context>
chip_gen: v7x
topology: tpu7x:2x2x1
jax: 0.10.0
libtpu: 0.0.40
codegen_flags: <defaults>
</compile_context>

<pallas_src>
import jax
import jax.numpy as jnp
from jax.experimental import pallas as pl
from jax.experimental.pallas import tpu as pltpu


# ----------------------------------------------------------------------------
# Pallas kernels
# ----------------------------------------------------------------------------
def xzw2_kernel(xz_ref, w2_ref, out_ref):
    """Row-tiled  (xZ @ W2)  in bf16 (feature side of the bundle aggregation)."""
    out_ref[...] = jnp.dot(xz_ref[...], w2_ref[...],
                           preferred_element_type=jnp.float32).astype(jnp.bfloat16)


def prep_kernel(x_ref, abc_ref, xzw2_ref, deg_ref, w1_ref, w4_ref,
                s_ref, h_ref, dinv_ref, zp_ref):
    """Row-tiled per-node precompute (everything that does NOT need full A):
         h    = D^{-1/2} (x @ W1)
         Zp   = Abc @ (xZ @ W2)            (bundle aggregation, bf16 MXU)
         S    = [h | Zp @ W4]  (bf16)      -> single fused A-matmul operand
    """
    x_lin = jnp.dot(x_ref[...], w1_ref[...], preferred_element_type=jnp.float32)
    dinv = jax.lax.rsqrt(deg_ref[...])                    # deg >= 1 (self-loop)
    h = dinv * x_lin                                      # (TM, D) f32

    # bundle aggregation: bf16 x bf16 on the MXU, f32 accumulate
    zp = jnp.dot(abc_ref[...], xzw2_ref[...], preferred_element_type=jnp.float32)
    zpw4 = jnp.dot(zp, w4_ref[...], preferred_element_type=jnp.float32)

    s_ref[...] = jnp.concatenate([h, zpw4], axis=1).astype(jnp.bfloat16)
    h_ref[...] = h
    dinv_ref[...] = dinv
    zp_ref[...] = zp


def agg_kernel(a_ref, s_ref, h_ref, dinv_ref, zp_ref,
               b1_ref, gamma_ref, beta_ref, wsq_ref, out_ref):
    """Row-tiled fused A-aggregation + LayerNorm + squeeze.
       R = A_blk @ [dinv*xW1 | Zp@W4]   (one big bf16 matmul instead of two)
       Xp = dinv * (R[:, :D] + h) + b1      (self-loop handled additively)
       Za = R[:, D:]
    """
    D = b1_ref.shape[1]
    eps = 1e-5
    gamma = gamma_ref[...]
    beta = beta_ref[...]

    r = jnp.dot(a_ref[...], s_ref[...], preferred_element_type=jnp.float32)  # (TM, 2D)
    xp = dinv_ref[...] * (r[:, :D] + h_ref[...]) + b1_ref[...]
    za = r[:, D:]
    zp = zp_ref[...]

    def layer_norm(v):
        mu = jnp.mean(v, axis=-1, keepdims=True)
        var = jnp.mean((v - mu) ** 2, axis=-1, keepdims=True)
        return (v - mu) * jax.lax.rsqrt(var + eps) * gamma + beta

    # fused squeeze: one (TM, 3D) x (3D, D) dot instead of three K=D dots
    cat = jnp.concatenate([layer_norm(xp), layer_norm(zp), layer_norm(za)], axis=1)
    # NOTE: D_out=32 (<128 lanes) output stays masked-store; a lane-dense
    # (N*D/128, 128) out_spec would need an in-kernel tile relayout - skipped
    # for lowering safety at these sizes.
    out_ref[...] = jnp.dot(cat, wsq_ref[...], preferred_element_type=jnp.float32)


def gcn_only_kernel(x_ref, a_ref, deg_ref, w1_ref, b1_ref, out_ref):
    """bc_feature is None / bc_assigment is None branch: just baselayer1."""
    x_lin = jnp.dot(x_ref[...], w1_ref[...], preferred_element_type=jnp.float32)
    dinv = jax.lax.rsqrt(deg_ref[...])
    h = dinv * x_lin
    agg = jnp.dot(a_ref[...], h.astype(jnp.bfloat16),
                  preferred_element_type=jnp.float32) + h
    out_ref[...] = dinv * agg + b1_ref[...]


# ----------------------------------------------------------------------------
# Wrapper (JAX glue: edge-index -> dense adjacency, vstack, pallas_call setup)
# ----------------------------------------------------------------------------
def _full_spec(shape):
    nd = len(shape)
    return pl.BlockSpec(tuple(shape), lambda *_: (0,) * nd)


def _row_spec(tm, cols):
    return pl.BlockSpec((tm, cols), lambda i: (i, 0))


def _row_tile(n, cap=256):
    if n <= cap:
        return n
    for t in (cap, 128, 64, 32, 16, 8):
        if n % t == 0:
            return t
    return n  # fallback: single full-row block


def _compiler_params(dimension_semantics):
    # Explicit VMEM limit (default scoped limit is 16/32 MiB << physical).
    try:
        cap = int(pltpu.get_tpu_info().vmem_capacity_bytes)
    except Exception:
        cap = 64 * 1024 * 1024
    return pltpu.CompilerParams(
        dimension_semantics=dimension_semantics,
        vmem_limit_bytes=cap * 3 // 4,
    )


def bcmp_layer2_forward(x, edge_index, bc_feature, bc_assigment, bset, params):
    N, d_in = x.shape
    D = params["W1"].shape[1]
    src, dst = edge_index[0], edge_index[1]

    # dense adjacency from edge_index:  A[dst, src] = 1  (messages flow src -> dst)
    # kept in bf16 (entries are exact small integers); deg computed O(E) directly.
    A_bf16 = (jnp.zeros((N, N), jnp.float32).at[dst, src].add(1.0)
              ).astype(jnp.bfloat16)
    deg = jnp.zeros((N, 1), jnp.float32).at[dst, 0].add(1.0) + 1.0  # +1 = self loop

    if bc_feature is None and bc_assigment is None:
        return pl.pallas_call(
            gcn_only_kernel,
            out_shape=jax.ShapeDtypeStruct((N, D), jnp.float32),
            grid=(1,),
            in_specs=[_full_spec(x.shape), _full_spec((N, N)), _full_spec((N, 1)),
                      _full_spec(params["W1"].shape), _full_spec(params["b1"].shape)],
            out_specs=_full_spec((N, D)),
            compiler_params=_compiler_params(("arbitrary",)),
        )(x, A_bf16, deg, params["W1"], params["b1"])

    B = bc_feature.shape[0]
    M = N + B
    xz = jnp.concatenate([x, bc_feature], axis=0)

    # bc_assigment_edges: for each bundle copy b, edge (src=bc_assigment[b*N+i], dst=i)
    rows = jnp.tile(jnp.arange(N), bset)
    Abc = (jnp.zeros((N, M), jnp.float32).at[rows, bc_assigment].add(1.0)
           ).astype(jnp.bfloat16)
    # TODO(synk): for very large N, replace the dense Abc matmul with a
    # scalar-prefetch row gather (Zp[i] = sum_b (xZ@W2)[assign[b,i]]) to drop the
    # N x (N+B) operand entirely; kept dense+bf16 here for general-case lowering
    # safety and because it stays MXU-resident at moderate N.

    # ---- pass 0: xZ @ W2 (row-tiled over N+B) --------------------------------
    TMM = _row_tile(M)
    xzw2 = pl.pallas_call(
        xzw2_kernel,
        out_shape=jax.ShapeDtypeStruct((M, D), jnp.bfloat16),
        grid=(M // TMM,),
        in_specs=[_row_spec(TMM, d_in), _full_spec(params["W2"].shape)],
        out_specs=_row_spec(TMM, D),
        compiler_params=_compiler_params(("parallel",)),
    )(xz, params["W2"])

    # ---- pass 1: per-node precompute (row-tiled over N) ----------------------
    TM = _row_tile(N)
    S, h, dinv, Zp = pl.pallas_call(
        prep_kernel,
        out_shape=(jax.ShapeDtypeStruct((N, 2 * D), jnp.bfloat16),
                   jax.ShapeDtypeStruct((N, D), jnp.float32),
                   jax.ShapeDtypeStruct((N, 1), jnp.float32),
                   jax.ShapeDtypeStruct((N, D), jnp.float32)),
        grid=(N // TM,),
        in_specs=[_row_spec(TM, d_in), _row_spec(TM, M), _full_spec((M, D)),
                  _row_spec(TM, 1), _full_spec(params["W1"].shape),
                  _full_spec(params["W4"].shape)],
        out_specs=(_row_spec(TM, 2 * D), _row_spec(TM, D),
                   _row_spec(TM, 1), _row_spec(TM, D)),
        compiler_params=_compiler_params(("parallel",)),
    )(x, Abc, xzw2, deg, params["W1"], params["W4"])

    # ---- pass 2: fused A-aggregation + LayerNorm + squeeze (row-tiled) -------
    out = pl.pallas_call(
        agg_kernel,
        out_shape=jax.ShapeDtypeStruct((N, D), jnp.float32),
        grid=(N // TM,),
        in_specs=[_row_spec(TM, N), _full_spec((N, 2 * D)), _row_spec(TM, D),
                  _row_spec(TM, 1), _row_spec(TM, D),
                  _full_spec(params["b1"].shape), _full_spec(params["gamma"].shape),
                  _full_spec(params["beta"].shape), _full_spec(params["WsqT"].shape)],
        out_specs=_row_spec(TM, D),
        compiler_params=_compiler_params(("parallel",)),
    )(A_bf16, S, h, dinv, Zp,
      params["b1"], params["gamma"], params["beta"], params["WsqT"])
    return out


# ----------------------------------------------------------------------------
# Pure-JAX f32 reference (same math) for a sanity check
# ----------------------------------------------------------------------------
def reference_forward(x, edge_index, Z, bc_assigment, bset, params):
    N = x.shape[0]
    B = Z.shape[0]
    A = jnp.zeros((N, N), jnp.float32).at[edge_index[1], edge_index[0]].add(1.0)
    rows = jnp.tile(jnp.arange(N), bset)
    Abc = jnp.zeros((N, N + B), jnp.float32).at[rows, bc_assigment].add(1.0)
    xz = jnp.concatenate([x, Z], axis=0)

    A_sl = A + jnp.eye(N)
    deg = jnp.sum(A_sl, axis=1, keepdims=True)
    dinv = 1.0 / jnp.sqrt(deg)
    A_hat = dinv * A_sl * dinv.T
    Xp = A_hat @ (x @ params["W1"]) + params["b1"]
    Zp = Abc @ (xz @ params["W2"])
    Za = A @ (Zp @ params["W4"])

    def ln(v):
        mu = jnp.mean(v, axis=-1, keepdims=True)
        var = jnp.mean((v - mu) ** 2, axis=-1, keepdims=True)
        return (v - mu) / jnp.sqrt(var + 1e-5) * params["gamma"] + params["beta"]

    cat = jnp.concatenate([ln(Xp), ln(Zp), ln(Za)], axis=1)
    return cat @ params["WsqT"]


def reference_gcn_only(x, edge_index, params):
    N = x.shape[0]
    A = jnp.zeros((N, N), jnp.float32).at[edge_index[1], edge_index[0]].add(1.0)
    A_sl = A + jnp.eye(N)
    deg = jnp.sum(A_sl, axis=1, keepdims=True)
    dinv = 1.0 / jnp.sqrt(deg)
    A_hat = dinv * A_sl * dinv.T
    return A_hat @ (x @ params["W1"]) + params["b1"]


# ----------------------------------------------------------------------------
def init_params(key, d_in, d_out):
    k1, k2, k3, k4 = jax.random.split(key, 4)
    return {
        "W1": 0.1 * jax.random.normal(k1, (d_in, d_out), jnp.float32),
        "b1": jnp.zeros((1, d_out), jnp.float32) + 0.01,
        "W2": 0.1 * jax.random.normal(k2, (d_in, d_out), jnp.float32),
        "W4": 0.1 * jax.random.normal(k3, (d_out, d_out), jnp.float32),
        "gamma": jnp.ones((1, d_out), jnp.float32),   # torch LayerNorm default init
        "beta": jnp.zeros((1, d_out), jnp.float32),
        "WsqT": 0.1 * jax.random.normal(k4, (3 * d_out, d_out), jnp.float32),
    }


if __name__ == "__main__":
    key = jax.random.PRNGKey(0)
    N, B, D_in, D_out, E, bset = 8, 4, 16, 32, 16, 2   # dimWX = (16, 32)
    keys = jax.random.split(key, 6)

    x = jax.random.normal(keys[0], (N, D_in), jnp.float32)
    bc_feature = jax.random.normal(keys[1], (B, D_in), jnp.float32)           # Z
    src = jax.random.randint(keys[2], (E,), 0, N)
    dst = jax.random.randint(keys[3], (E,), 0, N)
    edge_index = jnp.stack([src, dst]).astype(jnp.int32)                      # (2, E)
    # bc_assigment values index into vstack(x, Z), i.e. live in [N, N+B)
    bc_assigment = jax.random.randint(keys[4], (bset * N,), N, N + B).astype(jnp.int32)

    params = init_params(keys[5], D_in, D_out)

    out = jax.block_until_ready(
        bcmp_layer2_forward(x, edge_index, bc_feature, bc_assigment, bset, params))
    assert out.shape == (N, D_out)

    # bf16 adjacency / operand casts are intentional (per perf review) -> 2e-2 tol.
    ref = reference_forward(x, edge_index, bc_feature, bc_assigment, bset, params)
    assert jnp.allclose(out, ref, atol=2e-2, rtol=2e-2), "mismatch vs JAX reference"

    # bc_feature is None branch (forward returns baselayer1(x, edge_index) only)
    out0 = jax.block_until_ready(
        bcmp_layer2_forward(x, edge_index, None, None, 0, params))
    assert out0.shape == (N, D_out)
    ref0 = reference_gcn_only(x, edge_index, params)
    assert jnp.allclose(out0, ref0, atol=2e-2, rtol=2e-2), "mismatch (gcn-only branch)"

    print("KERNEL_OK")
</pallas_src>

<mosaic_0001>
module attributes {stable_mosaic.version = 11 : i64} {
  func.func @xzw2_kernel(%arg0: i32, %arg1: memref<12x16xf32, #tpu.memory_space<vmem>>, %arg2: memref<16x32xf32, #tpu.memory_space<vmem>>, %arg3: memref<12x32xbf16, #tpu.memory_space<vmem>>) attributes {dimension_semantics = [#tpu.dimension_semantics<parallel>], iteration_bounds = array<i64: 1>, scalar_prefetch = 0 : i64, scratch_operands = 0 : i64, tpu.core_type = #tpu.core_type<tc>, window_params = [{transform_indices = @transform_0, window_bounds = array<i64: 12, 16>}, {pipeline_mode = #tpu.pipeline_mode<synchronous>, transform_indices = @transform_1, window_bounds = array<i64: 16, 32>}, {transform_indices = @transform_2, window_bounds = array<i64: 12, 32>}]} {
    %c0 = arith.constant 0 : index
    %c0_0 = arith.constant 0 : index
    %0 = vector.load %arg1[%c0, %c0_0] : memref<12x16xf32, #tpu.memory_space<vmem>>, vector<12x16xf32>
    %c0_1 = arith.constant 0 : index
    %c0_2 = arith.constant 0 : index
    %1 = vector.load %arg2[%c0_1, %c0_2] : memref<16x32xf32, #tpu.memory_space<vmem>>, vector<16x32xf32>
    %cst = arith.constant dense<0.000000e+00> : vector<12x32xf32>
    %2 = tpu.matmul %0, %1, %cst {dimension_numbers = #tpu.dot_dimension_numbers<[1], [0], [0], [1], [0, 0, 1, 1], [], []>} : vector<12x16xf32>, vector<16x32xf32>, vector<12x32xf32> -> vector<12x32xf32>
    %3 = arith.truncf %2 : vector<12x32xf32> to vector<12x32xbf16>
    %c0_3 = arith.constant 0 : index
    %c0_4 = arith.constant 0 : index
    %4 = vector.load %arg3[%c0_3, %c0_4] : memref<12x32xbf16, #tpu.memory_space<vmem>>, vector<12x32xbf16>
    tpu.vector_store %arg3[%c0_3, %c0_4], %3 {strides = array<i32>} : memref<12x32xbf16, #tpu.memory_space<vmem>>, vector<12x32xbf16>,
    return
  }
  func.func @transform_0(%arg0: i32) -> (i32, i32) {
    %c0_i32 = arith.constant 0 : i32
    %c0_i32_0 = arith.constant 0 : i32
    return %arg0, %c0_i32 : i32, i32
  }
  func.func @transform_1(%arg0: i32) -> (i32, i32) {
    %c0_i32 = arith.constant 0 : i32
    %c0_i32_0 = arith.constant 0 : i32
    %c0_i32_1 = arith.constant 0 : i32
    return %c0_i32, %c0_i32_0 : i32, i32
  }
  func.func @transform_2(%arg0: i32) -> (i32, i32) {
    %c0_i32 = arith.constant 0 : i32
    %c0_i32_0 = arith.constant 0 : i32
    return %arg0, %c0_i32 : i32, i32
  }
}

</mosaic_0001>

<bundles_post_ra>
// kernel: tpu_custom_call.1
= control target key start
LH: loop header
LB: loop body
LE: loop exit
PB: predicated region body
PF: predicated region fallthrough
CT: control target
= control target key end

     0   :  { %7 = vsyncpa [#allocation3], 0  ;;  %s314_s0 = inlined_call_operand.hbm [shape: f32[12,16], index: 0, kind: input, shape index: {}]   ;;  %s315_s1 = inlined_call_operand.hbm [shape: f32[16,32], index: 1, kind: input, shape index: {}]   ;;  %s316_s2 = inlined_call_operand.hbm [shape: bf16[12,32], index: 2, kind: output, shape index: {}]  }
   0x1   :  { %8 = vsyncpa [#allocation6], 0 }
   0x2   :  { %9 = vsyncpa [#allocation4], 0  ;;  %s256_s9 = smov [#allocation2]   ;;  %s184_s13 = scalar_lea.hbm %s314_s0, 256 }
   0x3   :  { %s15_s10 = sshll.u32 %s256_s9, 4  ;;  %p185_p0 = scmp.ne.s32.totalorder %s314_s0, %s184_s13  ;;  %s16_s10 = int_to_ptr.vmem [resolvable:$true] %s15_s10 }
   0x4   :  { %p188_p1 = scmp.lt.u32.totalorder %s184_s13, %s314_s0 }
   0x6   :  { %p190_p2 = pnand %p188_p1, %p185_p0 }
   0x8   :  { %193 = shalt.err (!%p190_p2)
}
   0x9   :  { %s194_s18 = scalar_lea.vmem %s16_s10, 256  ;;  %p199_p4 = scmp.lt.s32.totalorder %s16_s10, %s16_s10 }
   0xa   :  { %p195_p3 = scmp.ne.s32.totalorder %s16_s10, %s194_s18  ;;  %p200_p5 = scmp.lt.s32.totalorder %s194_s18, %s194_s18 }
   0xc   :  { %p201_p6 = por %p200_p5, %p199_p4 }
   0xe   :  { %p202_p7 = pnand %p201_p6, %p195_p3 }
  0x10   :  { %205 = shalt.err (!%p202_p7)
}
  0x11   :  { %s257_s19 = smov 128   ;;  %s258_s20 = smov 8  }
  0x12   :  { %21 = dma.hbm_to_vmem [thread:$0]  %s314_s0, 256, %s16_s10, [#allocation3], %s257_s19, %s257_s19, %s258_s20  }
  0x13   :  { %s259_s23 = smov [#allocation5]   ;;  %s206_s27 = scalar_lea.hbm %s315_s1, 256 }
  0x14   :  { %s27_s24 = sshll.u32 %s259_s23, 4  ;;  %p207_p8 = scmp.ne.s32.totalorder %s315_s1, %s206_s27  ;;  %s28_s24 = int_to_ptr.vmem [resolvable:$true] %s27_s24 }
  0x15   :  { %p210_p9 = scmp.lt.u32.totalorder %s206_s27, %s315_s1 }
  0x17   :  { %p212_p10 = pnand %p210_p9, %p207_p8 }
  0x19   :  { %215 = shalt.err (!%p212_p10)
}
  0x1a   :  { %s216_s4 = scalar_lea.vmem %s28_s24, 256  ;;  %p221_p12 = scmp.lt.s32.totalorder %s28_s24, %s28_s24 }
  0x1b   :  { %p217_p11 = scmp.ne.s32.totalorder %s28_s24, %s216_s4  ;;  %p222_p13 = scmp.lt.s32.totalorder %s216_s4, %s216_s4 }
  0x1d   :  { %p223_p0 = por %p222_p13, %p221_p12 }
  0x1f   :  { %p224_p1 = pnand %p223_p0, %p217_p11 }
  0x21   :  { %227 = shalt.err (!%p224_p1)
}
  0x22   :  { %33 = dma.hbm_to_vmem [thread:$0]  %s315_s1, 256, %s28_s24, [#allocation6], %s257_s19, %s257_s19, %s258_s20  }
  0x23   :  { %250 = dma.done.wait [#allocation3], 256  }
  0x24   :  { %251 = vsyncadd [#allocation3], 4294967040 }
  0x25   :  { %252 = dma.done.wait [#allocation6], 256  }
  0x26   :  { %253 = vsyncadd [#allocation6], 4294967040  ;;  %vm44_vm0 = vcmask 130048   ;;  %v42_v0 = vld [vmem:[#allocation5] sm:$0xff]  ;;  %v43_v1 = vld [vmem:[#allocation5 + $0x8] sm:$0xff]  ;;  %s260_s6 = smov [#allocation7]  }
  0x27   :  { %v40_v2 = vld [vmem:[#allocation2] sm:$0xff]  ;;  %v173_v3 = vpack.c.bf16 %v43_v1, %v42_v0  ;;  %v41_v4 = vld [vmem:[#allocation2 + $0x8] sm:$0xf]  ;;  %s143_s7 = sshll.u32 %s260_s6, 4  ;;  %vm136_vm1 = vcmask 254976   ;;  %vm134_vm2 = vcmask 257024   ;;  %s144_s7 = int_to_ptr.vmem [resolvable:$true] %s143_s7 }
  0x28   :  { %170 = vmatprep.mubr.msk.f32.mxu0 %vm44_vm0, %v40_v2  ;;  %s228_s1 = scalar_lea.vmem %s144_s7, 128  ;;  %p233_p3 = scmp.lt.s32.totalorder %s144_s7, %s144_s7 }
  0x29   :  { %174 = vmatprep.subr.bf16.mxu0 %v173_v3  ;;  %p229_p2 = scmp.ne.s32.totalorder %s144_s7, %s228_s1  ;;  %p234_p4 = scmp.lt.s32.totalorder %s228_s1, %s228_s1 }
  0x2a   :  { %176 = vmatpush3.bf16.msra.mxu0 %v173_v3 }
  0x2b   :  { %p235_p5 = por %p234_p4, %p233_p3 }
  0x2d   :  { %171 = vmatmul.mubr.msk.f32.vlgmr.msra.gmra.mrb[0].mxu0 %vm44_vm0, %v41_v4  ;;  %p236_p6 = pnand %p235_p5, %p229_p2 }
 0x100   :  { %v172_v5 = vpop.f32.mrb[0].mxu0 }
 0x101   :  { %v161_v6 = vpack.c.bf16 %v172_v5, %v172_v5  ;;  %v117_v7 = vpop.f32.mrb[1].mxu0 }
 0x102   :  { %v160_v8 = vpack.c.bf16 %v117_v7, %v117_v7 }
 0x103   :  { %137 = vst.msk [vmem:[#allocation7 + $0x4] sm:$0x3] %vm136_vm1, %v161_v6 }
 0x104   :  { %135 = vst.msk [vmem:[#allocation7] sm:$0xf] %vm134_vm2, %v160_v8 }
 0x105   :  { %239 = shalt.err (!%p236_p6)
}
 0x106   :  { %s240_s10 = scalar_lea.hbm %s316_s2, 128 }
 0x107   :  { %p241_p7 = scmp.ne.s32.totalorder %s316_s2, %s240_s10  ;;  %p244_p8 = scmp.lt.u32.totalorder %s240_s10, %s316_s2 }
 0x109   :  { %p246_p9 = pnand %p244_p8, %p241_p7 }
 0x10b   :  { %249 = shalt.err (!%p246_p9)
}
 0x10c   :  { %s261_s15 = smov 64   ;;  %s262_s16 = smov 4  }
 0x10d   :  { %149 = dma.vmem_to_hbm [thread:$0]  %s144_s7, 128, %s316_s2, [#allocation4], %s261_s15, %s261_s15, %s262_s16  }
 0x10e   :  { %254 = dma.done.wait [#allocation4], 128  }
 0x10f   :  { %255 = vsyncadd [#allocation4], 4294967168 }
 0x110   :  { %153 = vsyncpa [#allocation3], 1 }
 0x111   :  { %154 = vsyncpa [#allocation6], 1 }
 0x112   :  { %155 = vsyncpa [#allocation4], 1 }

</bundles_post_ra>
